<compile_context>
chip_gen: v5e
topology: v5e:2x2
jax: 0.10.0
libtpu: 0.0.40
codegen_flags: <defaults>
</compile_context>

<pallas_src>
import functools

import jax
import jax.numpy as jnp
from jax import lax
from jax.experimental import pallas as pl
from jax.experimental.pallas import tpu as pltpu


def _round_up(x, m):
    return (x + m - 1) // m * m


# ----------------------------------------------------------------------------
# Pallas kernels
# ----------------------------------------------------------------------------
def _conv3x3_packed_kernel(w_ref, xm_ref, xh_ref, o_ref, xs_ref, *,
                           tap_offsets, cin, mt):
    """Shallow-channel path: one K = 9*cin matmul per output tile.

    w_ref : (Cout, 9*cin)      bf16   packed per-tap weights (grid-resident)
    xm_ref: (cin, mt)          bf16   this tile's flattened input window
    xh_ref: (cin, halo_pad)    bf16   the halo just past this tile
    o_ref : (Cout, mt)         bf16   lane-dense output tile
    xs_ref: (9*cin, mt)        bf16   VMEM staging buffer (fused im2col)
    """
    for i, off in enumerate(tap_offsets):        # unrolled, 9 taps, all static
        r0 = i * cin
        if off < mt:
            xs_ref[r0:r0 + cin, :mt - off] = xm_ref[:, off:]
        if off:
            xs_ref[r0:r0 + cin, mt - off:] = xh_ref[:, :off]
    o_ref[...] = jnp.dot(w_ref[...], xs_ref[...],
                         preferred_element_type=jnp.float32).astype(o_ref.dtype)


def _conv3x3_multitap_kernel(w_ref, xm_ref, xh_ref, o_ref, xt_ref, acc_ref, *,
                             tap_offsets, mt):
    """Deep-channel path (Cin >= 128): 9 full-K dots accumulated in VMEM f32."""
    for i, off in enumerate(tap_offsets):
        if off < mt:
            xt_ref[:, :mt - off] = xm_ref[:, off:]
        if off:
            xt_ref[:, mt - off:] = xh_ref[:, :off]
        contrib = jnp.dot(w_ref[i], xt_ref[...],
                          preferred_element_type=jnp.float32)
        if i == 0:
            acc_ref[...] = contrib
        else:
            acc_ref[...] += contrib
    o_ref[...] = acc_ref[...].astype(o_ref.dtype)


# ----------------------------------------------------------------------------
# Spectral norm (matches PyTorch utils.spectral_norm forward, 1 power iter).
# ----------------------------------------------------------------------------
def _l2_normalize(v, eps=1e-12):
    return v / (jnp.linalg.norm(v) + eps)


def spectral_norm_weight(w, u):
    cout = w.shape[0]
    w_mat = w.reshape(cout, -1)
    v = _l2_normalize(w_mat.T @ u)
    u_new = _l2_normalize(w_mat @ v)
    sigma = u_new @ (w_mat @ v)
    # TODO(synk): PyTorch's spectral_norm updates the `u` buffer in place every
    # forward; callers must thread `u_new` back into their state for training parity.
    return w / sigma, u_new


# ----------------------------------------------------------------------------
# Forward: stride=1, kernel=3, padding=dilation, padding_mode='reflect', no bias.
# ----------------------------------------------------------------------------
@functools.partial(jax.jit, static_argnames=("dilation",))
def conv3x3_forward(x, w, *, dilation=1):
    N, Cin, H, W = x.shape
    Cout = w.shape[0]
    d = dilation
    Hp, Wp = H + 2 * d, W + 2 * d

    # Pad each padded row to a lane multiple only when the waste is small
    # (large images): makes the kh tap offsets lane-aligned (review #9).
    wp128 = _round_up(Wp, 128)
    Wp_work = wp128 if wp128 * 4 <= Wp * 5 else Wp
    cin_pad = _round_up(Cin, 8)

    m_valid = H * Wp_work                       # flattened output positions kept
    halo = 2 * d * Wp_work + 2 * d              # extra input elems a tile needs
    halo_pad = _round_up(halo, 128)
    mt = max(min(512, _round_up(m_valid, 128)), halo_pad)   # lane-dense tile
    num_tiles = pl.cdiv(m_valid, mt)
    m_padded = num_tiles * mt
    l_full = (num_tiles + 1) * mt

    # Reflect pad (PyTorch padding_mode='reflect'), zero-pad channels to a
    # sublane multiple, optionally zero-pad rows, flatten spatial (contiguous).
    x_pad = jnp.pad(x, ((0, 0), (0, 0), (d, d), (d, d)), mode="reflect")
    if cin_pad != Cin:
        x_pad = jnp.pad(x_pad, ((0, 0), (0, cin_pad - Cin), (0, 0), (0, 0)))
    if Wp_work != Wp:
        x_pad = jnp.pad(x_pad, ((0, 0), (0, 0), (0, 0), (0, Wp_work - Wp)))
    x_flat = x_pad.reshape(N, cin_pad, Hp * Wp_work).astype(jnp.bfloat16)
    x_flat = jnp.pad(x_flat, ((0, 0), (0, 0), (0, l_full - Hp * Wp_work)))

    # Per-tile main window + its halo strip (so all in-kernel slices are static
    # and per-step VMEM is bounded by the tile, not the image).
    x_main = x_flat[:, :, :m_padded]
    x_halo = (x_flat[:, :, mt:]
              .reshape(N, cin_pad, num_tiles, mt)[:, :, :, :halo_pad]
              .reshape(N, cin_pad, num_tiles * halo_pad))

    # Flat-index offset of tap (kh, kw) relative to an output position.
    tap_offsets = tuple(kh * d * Wp_work + kw * d
                        for kh in range(3) for kw in range(3))

    pack = cin_pad < 128     # below MXU contraction width -> pack taps into K
    w_r = jnp.transpose(w, (0, 2, 3, 1))                     # (Cout, 3, 3, Cin)
    w_r = jnp.pad(w_r, ((0, 0), (0, 0), (0, 0), (0, cin_pad - Cin)))
    if pack:
        w_arg = w_r.reshape(Cout, 9 * cin_pad).astype(jnp.bfloat16)
        w_spec = pl.BlockSpec((Cout, 9 * cin_pad), lambda n, t: (0, 0))
        scratch = [pltpu.VMEM((9 * cin_pad, mt), jnp.bfloat16)]
        kernel = functools.partial(_conv3x3_packed_kernel,
                                   tap_offsets=tap_offsets, cin=cin_pad, mt=mt)
        xs_bytes = 9 * cin_pad * mt * 2
    else:
        w_arg = jnp.transpose(w_r, (1, 2, 0, 3)).reshape(
            9, Cout, cin_pad).astype(jnp.bfloat16)
        w_spec = pl.BlockSpec((9, Cout, cin_pad), lambda n, t: (0, 0, 0))
        scratch = [pltpu.VMEM((cin_pad, mt), jnp.bfloat16),
                   pltpu.VMEM((Cout, mt), jnp.float32)]
        kernel = functools.partial(_conv3x3_multitap_kernel,
                                   tap_offsets=tap_offsets, mt=mt)
        xs_bytes = cin_pad * mt * 2 + Cout * mt * 4

    # VMEM budget: double-buffered x tile + halo + out tile + weights + scratch.
    est_bytes = (2 * cin_pad * mt * 2 + 2 * cin_pad * halo_pad * 2 +
                 2 * Cout * mt * 2 + 2 * w_arg.size * 2 + xs_bytes)
    vmem_limit = int(min(64 * 2**20, max(32 * 2**20, 2 * est_bytes)))

    flops = 2 * N * Cout * 9 * cin_pad * m_padded
    bytes_accessed = (x_main.size * 2 + x_halo.size * 2 + w_arg.size * 2 +
                      N * Cout * m_padded * 2)

    out_flat = pl.pallas_call(
        kernel,
        out_shape=jax.ShapeDtypeStruct((N, Cout, m_padded), jnp.bfloat16),
        grid=(N, num_tiles),
        in_specs=[
            w_spec,                                                    # resident
            pl.BlockSpec((None, cin_pad, mt), lambda n, t: (n, 0, t)),        # tile
            pl.BlockSpec((None, cin_pad, halo_pad), lambda n, t: (n, 0, t)),  # halo
        ],
        out_specs=pl.BlockSpec((None, Cout, mt), lambda n, t: (n, 0, t)),
        scratch_shapes=scratch,
        compiler_params=pltpu.CompilerParams(
            dimension_semantics=("parallel", "parallel"),
            vmem_limit_bytes=vmem_limit,
        ),
        cost_estimate=pl.CostEstimate(
            flops=flops, transcendentals=0, bytes_accessed=bytes_accessed),
    )(w_arg, x_main, x_halo)

    # Crop: drop the lane-pad tail and the 2*d garbage columns per row.
    # (bf16 output halves this pass; cast to f32 here if a consumer needs it,
    #  the cast fuses into the same copy.)
    out = out_flat[:, :, :m_valid].reshape(N, Cout, H, Wp_work)[:, :, :, :W]
    return out


# ----------------------------------------------------------------------------
# Demo / self-check
# ----------------------------------------------------------------------------
def _reference_conv(x, w, d, op_dtype):
    """XLA reference: reflect pad + VALID dilated conv, f32 accumulation."""
    xp = jnp.pad(x, ((0, 0), (0, 0), (d, d), (d, d)), mode="reflect").astype(op_dtype)
    return lax.conv_general_dilated(
        xp, w.astype(op_dtype),
        window_strides=(1, 1), padding="VALID", rhs_dilation=(d, d),
        dimension_numbers=("NCHW", "OIHW", "NCHW"),
        preferred_element_type=jnp.float32)


if __name__ == "__main__":
    key = jax.random.PRNGKey(0)
    k_x, k_w, k_u, k_x2 = jax.random.split(key, 4)

    N, Cin, Cout, H, Wd = 2, 4, 8, 16, 16
    x = jax.random.normal(k_x, (N, Cin, H, Wd), dtype=jnp.float32)
    w = jax.random.normal(k_w, (Cout, Cin, 3, 3), dtype=jnp.float32) * 0.1
    u0 = _l2_normalize(jax.random.normal(k_u, (Cout,), dtype=jnp.float32))

    w_sn, _u_new = spectral_norm_weight(w, u0)

    # --- dilation=1, single spatial tile -------------------------------------
    out = jax.block_until_ready(conv3x3_forward(x, w_sn, dilation=1))
    assert out.shape == (N, Cout, H, Wd)
    out_f32 = out.astype(jnp.float32)
    ref_bf16 = _reference_conv(x, w_sn, 1, jnp.bfloat16)
    assert jnp.allclose(out_f32, ref_bf16, atol=1e-2, rtol=1e-2), "mismatch vs bf16 reference"
    ref_f32 = _reference_conv(x, w_sn, 1, jnp.float32)
    assert jnp.allclose(out_f32, ref_f32, atol=6e-2, rtol=6e-2), "mismatch vs f32 reference"

    # --- dilation=2 (padding=dilation, dilated taps) --------------------------
    out_d2 = jax.block_until_ready(conv3x3_forward(x, w_sn, dilation=2))
    assert out_d2.shape == (N, Cout, H, Wd)
    ref_d2 = _reference_conv(x, w_sn, 2, jnp.bfloat16)
    assert jnp.allclose(out_d2.astype(jnp.float32), ref_d2,
                        atol=1e-2, rtol=1e-2), "mismatch vs dilated reference"

    # --- larger image: exercises the multi-tile (halo) spatial grid -----------
    H2 = W2 = 40
    x2 = jax.random.normal(k_x2, (N, Cin, H2, W2), dtype=jnp.float32)
    out2 = jax.block_until_ready(conv3x3_forward(x2, w_sn, dilation=1))
    assert out2.shape == (N, Cout, H2, W2)
    ref2 = _reference_conv(x2, w_sn, 1, jnp.bfloat16)
    assert jnp.allclose(out2.astype(jnp.float32), ref2,
                        atol=1e-2, rtol=1e-2), "mismatch vs multi-tile reference"

    print("KERNEL_OK")
</pallas_src>

<mosaic_0001>
module attributes {stable_mosaic.version = 11 : i64} {
  func.func @_conv3x3_packed_kernel(%arg0: i32, %arg1: i32, %arg2: memref<8x72xbf16, #tpu.memory_space<vmem>>, %arg3: memref<1x8x384xbf16, #tpu.memory_space<vmem>>, %arg4: memref<1x8x128xbf16, #tpu.memory_space<vmem>>, %arg5: memref<1x8x384xbf16, #tpu.memory_space<vmem>>, %arg6: memref<72x384xbf16, #tpu.memory_space<vmem>>) attributes {dimension_semantics = [#tpu.dimension_semantics<parallel>, #tpu.dimension_semantics<parallel>], iteration_bounds = array<i64: 2, 1>, scalar_prefetch = 0 : i64, scratch_operands = 1 : i64, tpu.core_type = #tpu.core_type<tc>, window_params = [{pipeline_mode = #tpu.pipeline_mode<synchronous>, transform_indices = @transform_0, window_bounds = array<i64: 8, 72>}, {transform_indices = @transform_1, window_bounds = array<i64: 1, 8, 384>}, {transform_indices = @transform_2, window_bounds = array<i64: 1, 8, 128>}, {transform_indices = @transform_3, window_bounds = array<i64: 1, 8, 384>}]} {
    %c0 = arith.constant 0 : index
    %c0_0 = arith.constant 0 : index
    %c0_1 = arith.constant 0 : index
    %0 = vector.load %arg3[%c0, %c0_0, %c0_1] : memref<1x8x384xbf16, #tpu.memory_space<vmem>>, vector<1x8x384xbf16>
    %1 = vector.shape_cast %0 : vector<1x8x384xbf16> to vector<8x384xbf16>
    %c0_2 = arith.constant 0 : index
    %c0_3 = arith.constant 0 : index
    %2 = vector.load %arg6[%c0_2, %c0_3] : memref<72x384xbf16, #tpu.memory_space<vmem>>, vector<8x384xbf16>
    tpu.vector_store %arg6[%c0_2, %c0_3], %1 {strides = array<i32>} : memref<72x384xbf16, #tpu.memory_space<vmem>>, vector<8x384xbf16>,
    %c0_4 = arith.constant 0 : index
    %c0_5 = arith.constant 0 : index
    %c1 = arith.constant 1 : index
    %3 = vector.load %arg3[%c0_4, %c0_5, %c1] : memref<1x8x384xbf16, #tpu.memory_space<vmem>>, vector<1x8x383xbf16>
    %4 = vector.shape_cast %3 : vector<1x8x383xbf16> to vector<8x383xbf16>
    %c8 = arith.constant 8 : index
    %c0_6 = arith.constant 0 : index
    %5 = vector.load %arg6[%c8, %c0_6] : memref<72x384xbf16, #tpu.memory_space<vmem>>, vector<8x383xbf16>
    tpu.vector_store %arg6[%c8, %c0_6], %4 {strides = array<i32>} : memref<72x384xbf16, #tpu.memory_space<vmem>>, vector<8x383xbf16>,
    %c0_7 = arith.constant 0 : index
    %c0_8 = arith.constant 0 : index
    %c0_9 = arith.constant 0 : index
    %6 = vector.load %arg4[%c0_7, %c0_8, %c0_9] : memref<1x8x128xbf16, #tpu.memory_space<vmem>>, vector<1x8x1xbf16>
    %7 = vector.shape_cast %6 : vector<1x8x1xbf16> to vector<8x1xbf16>
    %c8_10 = arith.constant 8 : index
    %c383 = arith.constant 383 : index
    %8 = vector.load %arg6[%c8_10, %c383] : memref<72x384xbf16, #tpu.memory_space<vmem>>, vector<8x1xbf16>
    tpu.vector_store %arg6[%c8_10, %c383], %7 {strides = array<i32>} : memref<72x384xbf16, #tpu.memory_space<vmem>>, vector<8x1xbf16>,
    %c0_11 = arith.constant 0 : index
    %c0_12 = arith.constant 0 : index
    %c2 = arith.constant 2 : index
    %9 = vector.load %arg3[%c0_11, %c0_12, %c2] : memref<1x8x384xbf16, #tpu.memory_space<vmem>>, vector<1x8x382xbf16>
    %10 = vector.shape_cast %9 : vector<1x8x382xbf16> to vector<8x382xbf16>
    %c16 = arith.constant 16 : index
    %c0_13 = arith.constant 0 : index
    %11 = vector.load %arg6[%c16, %c0_13] : memref<72x384xbf16, #tpu.memory_space<vmem>>, vector<8x382xbf16>
    tpu.vector_store %arg6[%c16, %c0_13], %10 {strides = array<i32>} : memref<72x384xbf16, #tpu.memory_space<vmem>>, vector<8x382xbf16>,
    %c0_14 = arith.constant 0 : index
    %c0_15 = arith.constant 0 : index
    %c0_16 = arith.constant 0 : index
    %12 = vector.load %arg4[%c0_14, %c0_15, %c0_16] : memref<1x8x128xbf16, #tpu.memory_space<vmem>>, vector<1x8x2xbf16>
    %13 = vector.shape_cast %12 : vector<1x8x2xbf16> to vector<8x2xbf16>
    %c16_17 = arith.constant 16 : index
    %c382 = arith.constant 382 : index
    %14 = vector.load %arg6[%c16_17, %c382] : memref<72x384xbf16, #tpu.memory_space<vmem>>, vector<8x2xbf16>
    tpu.vector_store %arg6[%c16_17, %c382], %13 {strides = array<i32>} : memref<72x384xbf16, #tpu.memory_space<vmem>>, vector<8x2xbf16>,
    %c0_18 = arith.constant 0 : index
    %c0_19 = arith.constant 0 : index
    %c18 = arith.constant 18 : index
    %15 = vector.load %arg3[%c0_18, %c0_19, %c18] : memref<1x8x384xbf16, #tpu.memory_space<vmem>>, vector<1x8x366xbf16>
    %16 = vector.shape_cast %15 : vector<1x8x366xbf16> to vector<8x366xbf16>
    %c24 = arith.constant 24 : index
    %c0_20 = arith.constant 0 : index
    %17 = vector.load %arg6[%c24, %c0_20] : memref<72x384xbf16, #tpu.memory_space<vmem>>, vector<8x366xbf16>
    tpu.vector_store %arg6[%c24, %c0_20], %16 {strides = array<i32>} : memref<72x384xbf16, #tpu.memory_space<vmem>>, vector<8x366xbf16>,
    %c0_21 = arith.constant 0 : index
    %c0_22 = arith.constant 0 : index
    %c0_23 = arith.constant 0 : index
    %18 = vector.load %arg4[%c0_21, %c0_22, %c0_23] : memref<1x8x128xbf16, #tpu.memory_space<vmem>>, vector<1x8x18xbf16>
    %19 = vector.shape_cast %18 : vector<1x8x18xbf16> to vector<8x18xbf16>
    %c24_24 = arith.constant 24 : index
    %c366 = arith.constant 366 : index
    %20 = vector.load %arg6[%c24_24, %c366] : memref<72x384xbf16, #tpu.memory_space<vmem>>, vector<8x18xbf16>
    tpu.vector_store %arg6[%c24_24, %c366], %19 {strides = array<i32>} : memref<72x384xbf16, #tpu.memory_space<vmem>>, vector<8x18xbf16>,
    %c0_25 = arith.constant 0 : index
    %c0_26 = arith.constant 0 : index
    %c19 = arith.constant 19 : index
    %21 = vector.load %arg3[%c0_25, %c0_26, %c19] : memref<1x8x384xbf16, #tpu.memory_space<vmem>>, vector<1x8x365xbf16>
    %22 = vector.shape_cast %21 : vector<1x8x365xbf16> to vector<8x365xbf16>
    %c32 = arith.constant 32 : index
    %c0_27 = arith.constant 0 : index
    %23 = vector.load %arg6[%c32, %c0_27] : memref<72x384xbf16, #tpu.memory_space<vmem>>, vector<8x365xbf16>
    tpu.vector_store %arg6[%c32, %c0_27], %22 {strides = array<i32>} : memref<72x384xbf16, #tpu.memory_space<vmem>>, vector<8x365xbf16>,
    %c0_28 = arith.constant 0 : index
    %c0_29 = arith.constant 0 : index
    %c0_30 = arith.constant 0 : index
    %24 = vector.load %arg4[%c0_28, %c0_29, %c0_30] : memref<1x8x128xbf16, #tpu.memory_space<vmem>>, vector<1x8x19xbf16>
    %25 = vector.shape_cast %24 : vector<1x8x19xbf16> to vector<8x19xbf16>
    %c32_31 = arith.constant 32 : index
    %c365 = arith.constant 365 : index
    %26 = vector.load %arg6[%c32_31, %c365] : memref<72x384xbf16, #tpu.memory_space<vmem>>, vector<8x19xbf16>
    tpu.vector_store %arg6[%c32_31, %c365], %25 {strides = array<i32>} : memref<72x384xbf16, #tpu.memory_space<vmem>>, vector<8x19xbf16>,
    %c0_32 = arith.constant 0 : index
    %c0_33 = arith.constant 0 : index
    %c20 = arith.constant 20 : index
    %27 = vector.load %arg3[%c0_32, %c0_33, %c20] : memref<1x8x384xbf16, #tpu.memory_space<vmem>>, vector<1x8x364xbf16>
    %28 = vector.shape_cast %27 : vector<1x8x364xbf16> to vector<8x364xbf16>
    %c40 = arith.constant 40 : index
    %c0_34 = arith.constant 0 : index
    %29 = vector.load %arg6[%c40, %c0_34] : memref<72x384xbf16, #tpu.memory_space<vmem>>, vector<8x364xbf16>
    tpu.vector_store %arg6[%c40, %c0_34], %28 {strides = array<i32>} : memref<72x384xbf16, #tpu.memory_space<vmem>>, vector<8x364xbf16>,
    %c0_35 = arith.constant 0 : index
    %c0_36 = arith.constant 0 : index
    %c0_37 = arith.constant 0 : index
    %30 = vector.load %arg4[%c0_35, %c0_36, %c0_37] : memref<1x8x128xbf16, #tpu.memory_space<vmem>>, vector<1x8x20xbf16>
    %31 = vector.shape_cast %30 : vector<1x8x20xbf16> to vector<8x20xbf16>
    %c40_38 = arith.constant 40 : index
    %c364 = arith.constant 364 : index
    %32 = vector.load %arg6[%c40_38, %c364] : memref<72x384xbf16, #tpu.memory_space<vmem>>, vector<8x20xbf16>
    tpu.vector_store %arg6[%c40_38, %c364], %31 {strides = array<i32>} : memref<72x384xbf16, #tpu.memory_space<vmem>>, vector<8x20xbf16>,
    %c0_39 = arith.constant 0 : index
    %c0_40 = arith.constant 0 : index
    %c36 = arith.constant 36 : index
    %33 = vector.load %arg3[%c0_39, %c0_40, %c36] : memref<1x8x384xbf16, #tpu.memory_space<vmem>>, vector<1x8x348xbf16>
    %34 = vector.shape_cast %33 : vector<1x8x348xbf16> to vector<8x348xbf16>
    %c48 = arith.constant 48 : index
    %c0_41 = arith.constant 0 : index
    %35 = vector.load %arg6[%c48, %c0_41] : memref<72x384xbf16, #tpu.memory_space<vmem>>, vector<8x348xbf16>
    tpu.vector_store %arg6[%c48, %c0_41], %34 {strides = array<i32>} : memref<72x384xbf16, #tpu.memory_space<vmem>>, vector<8x348xbf16>,
    %c0_42 = arith.constant 0 : index
    %c0_43 = arith.constant 0 : index
    %c0_44 = arith.constant 0 : index
    %36 = vector.load %arg4[%c0_42, %c0_43, %c0_44] : memref<1x8x128xbf16, #tpu.memory_space<vmem>>, vector<1x8x36xbf16>
    %37 = vector.shape_cast %36 : vector<1x8x36xbf16> to vector<8x36xbf16>
    %c48_45 = arith.constant 48 : index
    %c348 = arith.constant 348 : index
    %38 = vector.load %arg6[%c48_45, %c348] : memref<72x384xbf16, #tpu.memory_space<vmem>>, vector<8x36xbf16>
    tpu.vector_store %arg6[%c48_45, %c348], %37 {strides = array<i32>} : memref<72x384xbf16, #tpu.memory_space<vmem>>, vector<8x36xbf16>,
    %c0_46 = arith.constant 0 : index
    %c0_47 = arith.constant 0 : index
    %c37 = arith.constant 37 : index
    %39 = vector.load %arg3[%c0_46, %c0_47, %c37] : memref<1x8x384xbf16, #tpu.memory_space<vmem>>, vector<1x8x347xbf16>
    %40 = vector.shape_cast %39 : vector<1x8x347xbf16> to vector<8x347xbf16>
    %c56 = arith.constant 56 : index
    %c0_48 = arith.constant 0 : index
    %41 = vector.load %arg6[%c56, %c0_48] : memref<72x384xbf16, #tpu.memory_space<vmem>>, vector<8x347xbf16>
    tpu.vector_store %arg6[%c56, %c0_48], %40 {strides = array<i32>} : memref<72x384xbf16, #tpu.memory_space<vmem>>, vector<8x347xbf16>,
    %c0_49 = arith.constant 0 : index
    %c0_50 = arith.constant 0 : index
    %c0_51 = arith.constant 0 : index
    %42 = vector.load %arg4[%c0_49, %c0_50, %c0_51] : memref<1x8x128xbf16, #tpu.memory_space<vmem>>, vector<1x8x37xbf16>
    %43 = vector.shape_cast %42 : vector<1x8x37xbf16> to vector<8x37xbf16>
    %c56_52 = arith.constant 56 : index
    %c347 = arith.constant 347 : index
    %44 = vector.load %arg6[%c56_52, %c347] : memref<72x384xbf16, #tpu.memory_space<vmem>>, vector<8x37xbf16>
    tpu.vector_store %arg6[%c56_52, %c347], %43 {strides = array<i32>} : memref<72x384xbf16, #tpu.memory_space<vmem>>, vector<8x37xbf16>,
    %c0_53 = arith.constant 0 : index
    %c0_54 = arith.constant 0 : index
    %c38 = arith.constant 38 : index
    %45 = vector.load %arg3[%c0_53, %c0_54, %c38] : memref<1x8x384xbf16, #tpu.memory_space<vmem>>, vector<1x8x346xbf16>
    %46 = vector.shape_cast %45 : vector<1x8x346xbf16> to vector<8x346xbf16>
    %c64 = arith.constant 64 : index
    %c0_55 = arith.constant 0 : index
    %47 = vector.load %arg6[%c64, %c0_55] : memref<72x384xbf16, #tpu.memory_space<vmem>>, vector<8x346xbf16>
    tpu.vector_store %arg6[%c64, %c0_55], %46 {strides = array<i32>} : memref<72x384xbf16, #tpu.memory_space<vmem>>, vector<8x346xbf16>,
    %c0_56 = arith.constant 0 : index
    %c0_57 = arith.constant 0 : index
    %c0_58 = arith.constant 0 : index
    %48 = vector.load %arg4[%c0_56, %c0_57, %c0_58] : memref<1x8x128xbf16, #tpu.memory_space<vmem>>, vector<1x8x38xbf16>
    %49 = vector.shape_cast %48 : vector<1x8x38xbf16> to vector<8x38xbf16>
    %c64_59 = arith.constant 64 : index
    %c346 = arith.constant 346 : index
    %50 = vector.load %arg6[%c64_59, %c346] : memref<72x384xbf16, #tpu.memory_space<vmem>>, vector<8x38xbf16>
    tpu.vector_store %arg6[%c64_59, %c346], %49 {strides = array<i32>} : memref<72x384xbf16, #tpu.memory_space<vmem>>, vector<8x38xbf16>,
    %c0_60 = arith.constant 0 : index
    %c0_61 = arith.constant 0 : index
    %51 = vector.load %arg2[%c0_60, %c0_61] : memref<8x72xbf16, #tpu.memory_space<vmem>>, vector<8x72xbf16>
    %c0_62 = arith.constant 0 : index
    %c0_63 = arith.constant 0 : index
    %52 = vector.load %arg6[%c0_62, %c0_63] : memref<72x384xbf16, #tpu.memory_space<vmem>>, vector<72x384xbf16>
    %cst = arith.constant dense<0.000000e+00> : vector<8x384xf32>
    %53 = tpu.matmul %51, %52, %cst {dimension_numbers = #tpu.dot_dimension_numbers<[1], [0], [0], [1], [0, 0, 1, 1], [], []>} : vector<8x72xbf16>, vector<72x384xbf16>, vector<8x384xf32> -> vector<8x384xf32>
    %54 = arith.truncf %53 : vector<8x384xf32> to vector<8x384xbf16>
    %c0_64 = arith.constant 0 : index
    %c0_65 = arith.constant 0 : index
    %c0_66 = arith.constant 0 : index
    %55 = vector.load %arg5[%c0_64, %c0_65, %c0_66] : memref<1x8x384xbf16, #tpu.memory_space<vmem>>, vector<1x8x384xbf16>
    %56 = vector.shape_cast %55 : vector<1x8x384xbf16> to vector<8x384xbf16>
    %57 = vector.shape_cast %54 : vector<8x384xbf16> to vector<1x8x384xbf16>
    tpu.vector_store %arg5[%c0_64, %c0_65, %c0_66], %57 {strides = array<i32>} : memref<1x8x384xbf16, #tpu.memory_space<vmem>>, vector<1x8x384xbf16>,
    return
  }
  func.func @transform_0(%arg0: i32, %arg1: i32) -> (i32, i32) {
    %c0_i32 = arith.constant 0 : i32
    %c0_i32_0 = arith.constant 0 : i32
    %c0_i32_1 = arith.constant 0 : i32
    return %c0_i32, %c0_i32_0 : i32, i32
  }
  func.func @transform_1(%arg0: i32, %arg1: i32) -> (i32, i32, i32) {
    %c0_i32 = arith.constant 0 : i32
    %c0_i32_0 = arith.constant 0 : i32
    return %arg0, %c0_i32, %arg1 : i32, i32, i32
  }
  func.func @transform_2(%arg0: i32, %arg1: i32) -> (i32, i32, i32) {
    %c0_i32 = arith.constant 0 : i32
    %c0_i32_0 = arith.constant 0 : i32
    return %arg0, %c0_i32, %arg1 : i32, i32, i32
  }
  func.func @transform_3(%arg0: i32, %arg1: i32) -> (i32, i32, i32) {
    %c0_i32 = arith.constant 0 : i32
    %c0_i32_0 = arith.constant 0 : i32
    return %arg0, %c0_i32, %arg1 : i32, i32, i32
  }
}

</mosaic_0001>

<bundles_post_ra>
// kernel: conv3x3_forward.1
= control target key start
LH: loop header
LB: loop body
LE: loop exit
PB: predicated region body
PF: predicated region fallthrough
CT: control target
= control target key end

     0   :  { %s852_s12 = smov 0   ;;  %s854_s13 = smov 0   ;;  %s932_s0 = inlined_call_operand.vmem [shape: bf16[8,72], index: 0, kind: input, shape index: {}]   ;;  %s933_s1 = inlined_call_operand.vmem [shape: bf16[2,8,384], index: 1, kind: input, shape index: {}]   ;;  %s934_s2 = inlined_call_operand.vmem [shape: bf16[2,8,128], index: 2, kind: input, shape index: {}]   ;;  %s935_s3 = inlined_call_operand.vmem [shape: bf16[2,8,384], index: 3, kind: output, shape index: {}]  }
   0x1   :  { %s856_s14 = smov 0  }
   0x2 LB: > { %s25_s15 = sadd.s32 1, %s818_s13  ;;  %p698_p0 = scmp.ge.s32.totalorder %s822_s14, 1  ;;  %s822_s14 = sphi %s856_s14, %s13_s14   ;;  %s818_s13 = sphi %s854_s13, %s937_s13   ;;  %s814_s12 = sphi %s852_s12, %s936_s12  }
   0x3   : > { %p27_p1 = scmp.ge.s32.totalorder %s25_s15, 2  ;;  %p172_p2 = scmp.lt.s32.totalorder %s822_s14, 3 }
   0x5   : > { %s939_s15 = smov (%p27_p1, %s25_s15), 0  ;;  %p173_p3 = pnand %p698_p0, %p172_p2 }
   0x6   : > { %p212_p4 = scmp.lt.s32.totalorder (!%p173_p3), %s814_s12, 1  ;;  %s824_s24 = smov (!%p173_p3), 90  }
   0x7   : > { %176 = sbr.rel (%p173_p3) target bundleno = 342 (0x156), region = 32  ;;  %s825_s25 = smov (!%p173_p3), 92  }
   0x8   : > { %s826_s26 = smov (!%p173_p3), 91   ;;  %s827_s27 = smov (!%p173_p3), 109  }
   0x9   : > { %s828_s28 = smov (!%p173_p3), 108   ;;  %s829_s29 = smov (!%p173_p3), 126  }
   0xa   : > { %s830_s30 = smov (!%p173_p3), 110   ;;  %s831_s4 = smov (!%p173_p3), 127  }
   0xc   : > { %s941_s12 = smov (!%p212_p4, %s814_s12), 1  ;;  %vm410_vm0 = vcmask 740352   ;;  %vm405_vm1 = vcmask 744448   ;;  %vm253_vm2 = vcmask 1043456   ;;  %vm435_vm3 = vcmask 732160  }
   0xd   : > { %s700_s16 = sshll.u32 %s941_s12, 2  ;;  %s767_s17 = smul.u32 12, %s941_s12  ;;  %vm442_vm4 = vcmask 1044176   ;;  %vm385_vm5 = vcmask 748544   ;;  %vm430_vm6 = vcmask 736256   ;;  %vm392_vm7 = vcmask 1044192  }
   0xe   : > { %s877_s20 = scalar_lea.vmem %s934_s2, %s700_s16  ;;  %vm417_vm8 = vcmask 1044184   ;;  %vm380_vm9 = vcmask 752640   ;;  %vm335_vm10 = vcmask 887808   ;;  %vm342_vm11 = vcmask 1044328  }
   0xf   : > { %v437_v0 = vld [vmem:[%s877_s20] sm:$0xf]  ;;  %s885_s23 = scalar_lea.vmem %s933_s1, %s767_s17  ;;  %vm360_vm12 = vcmask 879616   ;;  %vm355_vm13 = vcmask 883712   ;;  %vm367_vm14 = vcmask 1044320   ;;  %vm330_vm15 = vcmask 891904   ;;  %s236_s9 = scalar_lea.vmem %s935_s3, %s767_s17 }
  0x10   : > { %v387_v1 = vld [vmem:[%s877_s20] sm:$0xf]  ;;  %439 = vrot.lane.b32.xlu0 %v437_v0, %s824_s24  ;;  %v420_v3 = vld [vmem:[%s885_s23 + $0x8] sm:$0xf] }
  0x11   : > { %v419_v2 = vld [vmem:[%s885_s23] sm:$0xff]  ;;  %389 = vrot.lane.b32.xlu2 %v387_v1, %s825_s25  ;;  %v370_v4 = vld [vmem:[%s885_s23 + $0x8] sm:$0xf] }
  0x12   : > { %423 = vrot.lane.b32.xlu1 %v419_v2, %s824_s24  ;;  %241 = vst [vmem:[#allocation2] sm:$0xff] %v419_v2  ;;  %v395_v5 = vld [vmem:[%s885_s23 + $0x8] sm:$0xf]  ;;  %v412_v6 = vld [vmem:[%s877_s20] sm:$0xf] }
  0x13   : > { %v320_v7 = vld [vmem:[%s885_s23 + $0x8] sm:$0xf]  ;;  %v337_v9 = vld [vmem:[%s877_s20] sm:$0xf] }
  0x14   : > { %v345_v8 = vld [vmem:[%s885_s23 + $0x8] sm:$0xf]  ;;  %v362_v10 = vld [vmem:[%s877_s20] sm:$0xf] }
  0x15   : > { %v270_v11 = vld [vmem:[%s885_s23 + $0x8] sm:$0xf]  ;;  %v287_v13 = vld [vmem:[%s877_s20] sm:$0xf] }
  0x16   : > { %v295_v12 = vld [vmem:[%s885_s23 + $0x8] sm:$0xf]  ;;  %v312_v14 = vld [vmem:[%s877_s20] sm:$0xf] }
  0x17   : > { %v244_v15 = vld [vmem:[%s885_s23 + $0x8] sm:$0xf]  ;;  %v262_v16 = vld [vmem:[%s877_s20] sm:$0xf] }
  0x18   : > { %425 = vrot.lane.b32.xlu0 %v420_v3, %s824_s24  ;;  %v240_v58 = vld [vmem:[%s885_s23 + $0x8] sm:$0xf] }
  0x19   : > { %400 = vrot.lane.b32.xlu2 %v395_v5, %s826_s26  ;;  %242 = vst [vmem:[#allocation2 + $0x8] sm:$0xf] %v240_v58 }
  0x1a   : > { %375 = vrot.lane.b32.xlu1 %v370_v4, %s825_s25 }
  0x20   : > { %414 = vrot.lane.b32.xlu0 %v412_v6, %s826_s26 }
  0x21   : > { %398 = vrot.lane.b32.xlu2 %v419_v2, %s826_s26 }
  0x22   : > { %373 = vrot.lane.b32.xlu1 %v419_v2, %s825_s25 }
  0x28   : > { %325 = vrot.lane.b32.xlu0 %v320_v7, %s827_s27 }
  0x29   : > { %339 = vrot.lane.b32.xlu2 %v337_v9, %s827_s27 }
  0x2a   : > { %350 = vrot.lane.b32.xlu1 %v345_v8, %s828_s28 }
  0x30   : > { %364 = vrot.lane.b32.xlu0 %v362_v10, %s828_s28 }
  0x31   : > { %348 = vrot.lane.b32.xlu2 %v419_v2, %s828_s28 }
  0x32   : > { %323 = vrot.lane.b32.xlu1 %v419_v2, %s827_s27 }
  0x38   : > { %275 = vrot.lane.b32.xlu0 %v270_v11, %s829_s29 }
  0x39   : > { %289 = vrot.lane.b32.xlu2 %v287_v13, %s829_s29 }
  0x3a   : > { %300 = vrot.lane.b32.xlu1 %v295_v12, %s830_s30 }
  0x40   : > { %314 = vrot.lane.b32.xlu0 %v312_v14, %s830_s30 }
  0x41   : > { %298 = vrot.lane.b32.xlu2 %v419_v2, %s830_s30 }
  0x42   : > { %273 = vrot.lane.b32.xlu1 %v419_v2, %s829_s29 }
  0x48   : > { %249 = vrot.lane.b32.xlu0 %v244_v15, %s831_s4 }
  0x49   : > { %247 = vrot.lane.b32.xlu2 %v419_v2, %s831_s4 }
  0x4a   : > { %264 = vrot.lane.b32.xlu1 %v262_v16, %s831_s4 }
  0x6b   : > { %v390_v17 = vpop.permute.xlu2 %389 }
  0x73   : > { %v401_v18 = vpop.permute.xlu2 %400 }
  0x74   : > { %411 = vst.msk [vmem:[#allocation2 + $0x5c] sm:$0xf] %vm410_vm0, %v401_v18  ;;  %v403_v19 = vrot.slane %v401_v18, 4  ;;  %vm285_vm0 = vcmask 1027072  }
  0x7b   : > { %v399_v20 = vpop.permute.xlu2 %398 }
  0x7c   : > { %v402_v21 = vrot.slane %v399_v20, 4 }
  0x7e   : > { %v404_v22 = vsel %vm253_vm2, %v402_v21, %v403_v19 }
  0x7f   : > { %v406_v23 = vsel %vm405_vm1, %v399_v20, %v404_v22  ;;  %vm292_vm1 = vcmask 1044464  }
  0x80   : > { %409 = vst [vmem:[#allocation2 + $0x54] sm:$0xff] %v406_v23 }
  0x82   : > { %v440_v24 = vpop.permute.xlu0 %439 }
  0x83   : > { %v340_v26 = vpop.permute.xlu2 %339 }
  0x84   : > { %v424_v25 = vpop.permute.xlu1 %423 }
  0x85   : > { %v427_v28 = vrot.slane %v424_v25, 4 }
  0x87   : > { %v765_v60 = vld [vmem:[#allocation2 + $0x50] sm:$0xf0]  ;;  %v742_v0 = vld [vmem:[#allocation2 + $0x54] sm:$0xf0] }
  0x8a   : > { %v426_v27 = vpop.permute.xlu0 %425 }
  0x8b   : > { %v428_v29 = vrot.slane %v426_v27, 4  ;;  %436 = vst.msk [vmem:[#allocation2 + $0x68] sm:$0xf] %vm435_vm3, %v426_v27  ;;  %v349_v40 = vpop.permute.xlu2 %348  ;;  %vm310_vm3 = vcmask 896000  }
  0x8c   : > { %v376_v30 = vpop.permute.xlu1 %375  ;;  %443 = vst.msk [vmem:[#allocation2 + $0x68] sm:$0xf] %vm442_vm4, %v440_v24  ;;  %v352_v51 = vrot.slane %v349_v40, 4  ;;  %vm305_vm4 = vcmask 900096  }
  0x8d   : > { %v429_v31 = vsel %vm253_vm2, %v427_v28, %v428_v29  ;;  %386 = vst.msk [vmem:[#allocation2 + $0x50] sm:$0xf] %vm385_vm5, %v376_v30  ;;  %v378_v43 = vrot.slane %v376_v30, 4  ;;  %vm317_vm5 = vcmask 1044336  }
  0x8e   : > { %v431_v32 = vsel %vm430_vm6, %v424_v25, %v429_v31  ;;  %393 = vst.msk [vmem:[#allocation2 + $0x50] sm:$0xf] %vm392_vm7, %v390_v17  ;;  %vm280_vm6 = vcmask 1031168   ;;  %vm260_vm7 = vcmask 1035264  }
  0x8f   : > { %v505_v33 = vunpack.c.l.b16 %v431_v32  ;;  %v506_v34 = vunpack.c.h.b16 %v431_v32 }
  0x91   : > { %v520_v35 = vpack.c.b16 %v505_v33, %v505_v33  ;;  %v521_v36 = vpack.c.b16 %v506_v34, %v506_v34 }
  0x92   : > { %v415_v37 = vpop.permute.xlu0 %414 }
  0x93   : > { %418 = vst.msk [vmem:[#allocation2 + $0x5c] sm:$0xf] %vm417_vm8, %v415_v37  ;;  %v462_v39 = vld [vmem:[#allocation2 + $0x68] sm:$0xf]  ;;  %v541_v41 = vsel %vm253_vm2, %v520_v35, 0  ;;  %v544_v42 = vsel %vm253_vm2, %v521_v36, 0  ;;  %v290_v57 = vpop.permute.xlu2 %289 }
  0x94   : > { %v374_v38 = vpop.permute.xlu1 %373  ;;  %v507_v45 = vunpack.c.l.b16 %v462_v39  ;;  %552 = vmatpush.bf16.msra.mxu0 %v541_v41  ;;  %565 = vmatpush.bf16.msra.mxu1 %v544_v42  ;;  %vm267_vm8 = vcmask 1044472  }
  0x95   : > { %v377_v44 = vrot.slane %v374_v38, 4  ;;  %v748_v52 = vld [vmem:[#allocation2 + $0x50] sm:$0xf] }
  0x96   : > { %v522_v47 = vpack.c.b16 %v507_v45, %v507_v45 }
  0x97   : > { %v379_v46 = vsel %vm253_vm2, %v377_v44, %v378_v43 }
  0x98   : > { %v381_v48 = vsel %vm380_vm9, %v374_v38, %v379_v46  ;;  %v547_v49 = vsel %vm253_vm2, %v522_v47, 0  ;;  %vm255_vm9 = vcmask 1039360   ;;  %v712_v47 = vld [vmem:[#allocation2 + $0x8] sm:$0xf] }
  0x99   : > { %384 = vst [vmem:[#allocation2 + $0x48] sm:$0xff] %v381_v48  ;;  %578 = vmatpush.bf16.msra.mxu2 %v547_v49 }
  0x9a   : > { %v326_v50 = vpop.permute.xlu0 %325  ;;  %v766_v53 = vld [vmem:[#allocation2 + $0x58] sm:$0xf0] }
  0x9b   : > { %336 = vst.msk [vmem:[#allocation2 + $0x38] sm:$0xf] %vm335_vm10, %v326_v50  ;;  %v749_v55 = vor.u32 %v766_v53, %v748_v52  ;;  %v328_v5 = vrot.slane %v326_v50, 4  ;;  %v299_v9 = vpop.permute.xlu2 %298  ;;  %v704_v50 = vld [vmem:[#allocation2] sm:$0xf] }
  0x9c   : > { %v351_v54 = vpop.permute.xlu1 %350  ;;  %343 = vst.msk [vmem:[#allocation2 + $0x38] sm:$0xf] %vm342_vm11, %v340_v26  ;;  %v302_v11 = vrot.slane %v299_v9, 4 }
  0x9d   : > { %v353_v56 = vrot.slane %v351_v54, 4  ;;  %361 = vst.msk [vmem:[#allocation2 + $0x44] sm:$0xf] %vm360_vm12, %v351_v54  ;;  %579 = vmatpush.bf16.msra.mxu2 %v749_v55 }
  0x9f   : > { %v354_v59 = vsel %vm253_vm2, %v352_v51, %v353_v56  ;;  %v755_v51 = vld [vmem:[#allocation2 + $0x4] sm:$0xf]  ;;  %v444_v56 = vld [vmem:[%s932_s0] sm:$0xf] }
  0xa0   : > { %v356_v61 = vsel %vm355_vm13, %v349_v40, %v354_v59  ;;  %v740_v62 = vld [vmem:[#allocation2 + $0x48] sm:$0xf]  ;;  %v764_v63 = vld [vmem:[#allocation2 + $0x4c] sm:$0xf] }
  0xa1   : > { %359 = vst [vmem:[#allocation2 + $0x3c] sm:$0xff] %v356_v61  ;;  %v741_v1 = vor.u32 %v765_v60, %v740_v62  ;;  %v745_v2 = vor.u32 %v764_v63, %v742_v0 }
  0xa2   : > { %v365_v3 = vpop.permute.xlu0 %364 }
  0xa3   : > { %553 = vmatpush.bf16.msra.mxu0 %v741_v1  ;;  %566 = vmatpush.bf16.msra.mxu1 %v745_v2  ;;  %368 = vst.msk [vmem:[#allocation2 + $0x44] sm:$0xf] %vm367_vm14, %v365_v3  ;;  %v736_v12 = vld [vmem:[#allocation2 + $0x38] sm:$0xf]  ;;  %v248_v30 = vpop.permute.xlu2 %247 }
  0xa4   : > { %v324_v4 = vpop.permute.xlu1 %323  ;;  %v251_v32 = vrot.slane %v248_v30, 4 }
  0xa5   : > { %v327_v6 = vrot.slane %v324_v4, 4 }
  0xa7   : > { %v329_v7 = vsel %vm253_vm2, %v327_v6, %v328_v5 }
  0xa8   : > { %v331_v8 = vsel %vm330_vm15, %v324_v4, %v329_v7  ;;  %v762_v18 = vld [vmem:[#allocation2 + $0x38] sm:$0xf0]  ;;  %v730_v22 = vld [vmem:[#allocation2 + $0x3c] sm:$0xf0] }
  0xa9   : > { %334 = vst [vmem:[#allocation2 + $0x30] sm:$0xff] %v331_v8 }
  0xaa   : > { %v276_v10 = vpop.permute.xlu0 %275  ;;  %v763_v13 = vld [vmem:[#allocation2 + $0x40] sm:$0xf0] }
  0xab   : > { %286 = vst.msk [vmem:[#allocation2 + $0x20] sm:$0xf] %vm285_vm0, %v276_v10  ;;  %v737_v15 = vor.u32 %v763_v13, %v736_v12  ;;  %v278_v27 = vrot.slane %v276_v10, 4 }
  0xac   : > { %v301_v14 = vpop.permute.xlu1 %300  ;;  %293 = vst.msk [vmem:[#allocation2 + $0x20] sm:$0xf] %vm292_vm1, %v290_v57 }
  0xad   : > { %v303_v16 = vrot.slane %v301_v14, 4  ;;  %311 = vst.msk [vmem:[#allocation2 + $0x2c] sm:$0xf] %vm310_vm3, %v301_v14  ;;  %580 = vmatpush.bf16.msra.mxu2 %v737_v15 }
  0xaf   : > { %v304_v17 = vsel %vm253_vm2, %v302_v11, %v303_v16 }
  0xb0   : > { %v306_v19 = vsel %vm305_vm4, %v299_v9, %v304_v17  ;;  %v728_v20 = vld [vmem:[#allocation2 + $0x30] sm:$0xf]  ;;  %v761_v21 = vld [vmem:[#allocation2 + $0x34] sm:$0xf] }
  0xb1   : > { %309 = vst [vmem:[#allocation2 + $0x24] sm:$0xff] %v306_v19  ;;  %v729_v23 = vor.u32 %v762_v18, %v728_v20  ;;  %v733_v24 = vor.u32 %v761_v21, %v730_v22 }
  0xb2   : > { %v315_v25 = vpop.permute.xlu0 %314 }
  0xb3   : > { %554 = vmatpush.bf16.msra.mxu0 %v729_v23  ;;  %567 = vmatpush.bf16.msra.mxu1 %v733_v24  ;;  %318 = vst.msk [vmem:[#allocation2 + $0x2c] sm:$0xf] %vm317_vm5, %v315_v25  ;;  %v724_v34 = vld [vmem:[#allocation2 + $0x20] sm:$0xf] }
  0xb4   : > { %v274_v26 = vpop.permute.xlu1 %273 }
  0xb5   : > { %v277_v28 = vrot.slane %v274_v26, 4 }
  0xb7   : > { %v279_v29 = vsel %vm253_vm2, %v277_v28, %v278_v27 }
  0xb8   : > { %v281_v31 = vsel %vm280_vm6, %v274_v26, %v279_v29  ;;  %v759_v41 = vld [vmem:[#allocation2 + $0x20] sm:$0xf0]  ;;  %v718_v42 = vld [vmem:[#allocation2 + $0x24] sm:$0xf0] }
  0xb9   : > { %284 = vst [vmem:[#allocation2 + $0x18] sm:$0xff] %v281_v31 }
  0xba   : > { %v250_v33 = vpop.permute.xlu0 %249  ;;  %v760_v35 = vld [vmem:[#allocation2 + $0x28] sm:$0xf0] }
  0xbb   : > { %v252_v36 = vrot.slane %v250_v33, 4  ;;  %261 = vst.msk [vmem:[#allocation2 + $0x14] sm:$0xf] %vm260_vm7, %v250_v33  ;;  %v725_v38 = vor.u32 %v760_v35, %v724_v34 }
  0xbc   : > { %v265_v37 = vpop.permute.xlu1 %264 }
  0xbd   : > { %268 = vst.msk [vmem:[#allocation2 + $0x14] sm:$0xf] %vm267_vm8, %v265_v37  ;;  %v254_v39 = vsel %vm253_vm2, %v251_v32, %v252_v36  ;;  %581 = vmatpush.bf16.msra.mxu2 %v725_v38  ;;  %vm535_vm2 = vcmask 588800  }
  0xbe   : > { %v256_v40 = vsel %vm255_vm9, %v248_v30, %v254_v39 }
  0xbf   : > { %259 = vst [vmem:[#allocation2 + $0xc] sm:$0xff] %v256_v40 }
  0xc0   : > { %v716_v43 = vld [vmem:[#allocation2 + $0x18] sm:$0xf]  ;;  %v758_v44 = vld [vmem:[#allocation2 + $0x1c] sm:$0xf] }
  0xc1   : > { %v717_v45 = vor.u32 %v759_v41, %v716_v43  ;;  %v721_v46 = vor.u32 %v758_v44, %v718_v42 }
  0xc3   : > { %555 = vmatpush.bf16.msra.mxu0 %v717_v45  ;;  %568 = vmatpush.bf16.msra.mxu1 %v721_v46 }
  0xc4   : > { %v757_v48 = vld [vmem:[#allocation2 + $0x10] sm:$0xf0] }
  0xc5   : > { %v713_v49 = vor.u32 %v757_v48, %v712_v47 }
  0xc6   : > { %v756_v52 = vld [vmem:[#allocation2 + $0x8] sm:$0xf0]  ;;  %v706_v53 = vld [vmem:[#allocation2 + $0xc] sm:$0xf0] }
  0xc7   : > { %582 = vmatpush.bf16.msra.mxu2 %v713_v49  ;;  %v705_v54 = vor.u32 %v756_v52, %v704_v50  ;;  %v709_v55 = vor.u32 %v755_v51, %v706_v53 }
  0xc9   : > { %556 = vmatpush.bf16.msra.mxu0 %v705_v54  ;;  %569 = vmatpush.bf16.msra.mxu1 %v709_v55 }
  0xca   : > { %752 = vmatmul.msk.bf16.vlgmr.msra.gmra.mxu2 %vm535_vm2, %v444_v56 }
  0xcc   : > { %750 = vmatmul.msk.bf16.vlgmr.msra.gmra.mxu0 %vm535_vm2, %v444_v56  ;;  %751 = vmatmul.msk.bf16.vlgmr.msra.gmra.mxu1 %vm535_vm2, %v444_v56 }
 0x149   : > { %v558_v57 = vpop.f32.mrf.mxu0  ;;  %v571_v58 = vpop.f32.mrf.mxu1 }
 0x14a   : > { %v588_v59 = vpack.c.bf16 %v571_v58, %v558_v57 }
 0x14c   : > { %590 = vst [vmem:[%s236_s9] sm:$0xff] %v588_v59 }
 0x14d   : > { %v584_v60 = vpop.f32.mrf.mxu2 }
 0x14e   : > { %v589_v61 = vpack.c.bf16 %v584_v60, %v584_v60 }
 0x150   : > { %591 = vst [vmem:[%s236_s9 + $0x8] sm:$0xf] %v589_v61 }
 0x151   : > { %v560_v62 = vpop.f32.mrf.mxu0  ;;  %v573_v63 = vpop.f32.mrf.mxu1 }
 0x155   : > { %v586_v0 = vpop.f32.mrf.mxu2 }
 0x156 PF: > { %s13_s14 = sadd.s32 1, %s822_s14   ;;  %s936_s12 = smov %s818_s13 }
 0x157   : > { %p10_p5 = scmp.ge.s32.totalorder %s13_s14, 4   ;;  %s937_s13 = smov %s939_s15 }
 0x159   :  { %12 = sbr.rel (!%p10_p5) target bundleno = 2 (0x2), region = 65 }

</bundles_post_ra>
